<compile_context>
chip_gen: v5e
topology: v5e:2x2
jax: 0.10.0
libtpu: 0.0.40
codegen_flags: <defaults>
</compile_context>

<pallas_src>
import jax
import jax.numpy as jnp
from jax import lax
from jax.experimental import pallas as pl
from jax.experimental.pallas import tpu as pltpu


def _round_up(x: int, m: int) -> int:
    return ((x + m - 1) // m) * m


def _cdiv(a: int, b: int) -> int:
    return (a + b - 1) // b


def _choose_batch_tile(B: int, block_batch: int) -> int:
    """Pick the batch tile TB (multiple of 128, on the lane axis)."""
    b128 = _round_up(max(B, 1), 128)
    tb = min(_round_up(block_batch, 128), b128)
    # Keep >= ~4 grid steps when the batch is large enough so the "parallel"
    # axis shards across TensorCores (v7x megacore) and the x/out DMAs have
    # room to pipeline.  Never increases TB, never drops below 128.
    if b128 // tb < 4 and b128 >= 4 * 128:
        tb = _round_up(_cdiv(b128, 4), 128)
    return tb


def _vae_kernel(x_ref,
                w1_ref, b1_ref,
                w2_ref, b2_ref,
                wdf_ref, bdf_ref,
                wd2_ref, bd2_ref,
                wd3_ref, bd3_ref,
                o_ref):
    # x arrives batch-major (TB, nf).  Cast to bf16 at the dot input only.
    x = x_ref[...].astype(jnp.bfloat16)

    def dense(w_ref, b_ref, act_f32):
        # w: (out, in) bf16;  act: (in, TB) f32 -> cast to bf16 for the MXU.
        y = jnp.dot(w_ref[...], act_f32.astype(jnp.bfloat16),
                    preferred_element_type=jnp.float32)
        return y + b_ref[...]                       # bias is an (out, 1) f32 column

    # struct_enc layer 1: contract the feature (lane) axis of the raw x tile
    # directly against w1's input axis (A @ B^T on the MXU) so activations
    # come out (h1, TB) with batch on lanes -- no transpose pass anywhere.
    h = lax.dot_general(w1_ref[...], x, (((1,), (1,)), ((), ())),
                        preferred_element_type=jnp.float32) + b1_ref[...]
    h = jnp.maximum(h, 0.0)                                         # (h1, TB)
    h = jnp.maximum(dense(w2_ref, b2_ref, h), 0.0)                  # (h2, TB)

    # mu_layer is folded into the first decoder layer (wdf = wd1 @ wmu).
    d = jnp.maximum(dense(wdf_ref, bdf_ref, h), 0.0)                # (h2, TB)
    d = jnp.maximum(dense(wd2_ref, bd2_ref, d), 0.0)                # (h1, TB)

    # Final (h1 -> 1) layer: VPU multiply + sublane (XLU) reduction instead of
    # an N=1 MXU matmul.  wd3 is an (h1, 1) f32 column, bd3 is (1, 1) f32.
    out = jnp.sum(d * wd3_ref[...], axis=0, keepdims=True) + bd3_ref[...]

    o_ref[...] = out.astype(o_ref.dtype)            # (1, TB) lane-dense store


def _prepare_kernel_params(params):
    """PyTorch-layout f32 params -> kernel operands (bf16 weights, folded mu)."""
    f32, bf16 = jnp.float32, jnp.bfloat16
    w1 = params["w1"].astype(bf16)
    b1 = params["b1"].astype(f32)
    w2 = params["w2"].astype(bf16)
    b2 = params["b2"].astype(f32)
    # mu_layer has no activation and mu is never an output, so fold it into
    # the first decoder layer (done once, in f32, on tiny matrices):
    #   wd1 @ (wmu @ h + bmu) + bd1 == (wd1 @ wmu) @ h + (wd1 @ bmu + bd1)
    wmu = params["wmu"].astype(f32)
    bmu = params["bmu"].astype(f32)
    wd1 = params["wd1"].astype(f32)
    bd1 = params["bd1"].astype(f32)
    wdf = (wd1 @ wmu).astype(bf16)
    bdf = wd1 @ bmu + bd1
    wd2 = params["wd2"].astype(bf16)
    bd2 = params["bd2"].astype(f32)
    wd3 = params["wd3"].astype(f32).T          # (1, h1) -> (h1, 1) column
    bd3 = params["bd3"].astype(f32)            # (1, 1)
    return (w1, b1, w2, b2, wdf, bdf, wd2, bd2, wd3, bd3)


def struct2param_vae_forward(features, params, *, block_batch: int = 4096):
    """features: (B, num_features) float (f32 or bf16), natural row-major layout.

    params: PyTorch-layout weights (out, in) and biases (out, 1) in f32.
    Returns: (B,) f32, matching the PyTorch module's `.squeeze()` output.
    """
    B, nf = features.shape
    if B == 0:
        return jnp.zeros((0,), jnp.float32)

    TB = _choose_batch_tile(B, block_batch)
    B_pad = _round_up(B, TB)

    # Keep the input in its natural (B, nf) layout (no wrapper transpose pass
    # over HBM); only pad the batch axis when it isn't a multiple of TB.
    x = features if B_pad == B else jnp.pad(features, ((0, B_pad - B), (0, 0)))

    weights = _prepare_kernel_params(params)

    # x / out are tiled along the batch axis; weights & biases use constant
    # index_maps so they stay VMEM-resident across grid steps.
    x_spec = pl.BlockSpec((TB, nf), lambda i: (i, 0))
    w_specs = [pl.BlockSpec(w.shape, lambda i: (0, 0)) for w in weights]
    out_spec = pl.BlockSpec((1, TB), lambda i: (0, i))

    out = pl.pallas_call(
        _vae_kernel,
        out_shape=jax.ShapeDtypeStruct((1, B_pad), jnp.float32),
        grid=(B_pad // TB,),
        in_specs=[x_spec] + w_specs,
        out_specs=out_spec,
        compiler_params=pltpu.CompilerParams(
            dimension_semantics=("parallel",),
            vmem_limit_bytes=32 * 1024 * 1024,
        ),
    )(x, *weights)

    # Padded batch columns produce bias-driven values; slice them off.
    return out[0, :B]


def init_params(key, num_features, rep_dims, h1, h2):
    """Deterministic synthetic init (uniform, like PyTorch's default Linear init).

    All params are kept in PyTorch layout: weights (out, in), biases (out, 1).
    """
    def linear(key, fan_in, fan_out):
        kw, kb = jax.random.split(key)
        bound = 1.0 / (fan_in ** 0.5)
        w = jax.random.uniform(kw, (fan_out, fan_in), jnp.float32, -bound, bound)
        b = jax.random.uniform(kb, (fan_out, 1), jnp.float32, -bound, bound)
        return w, b

    keys = jax.random.split(key, 6)
    w1, b1 = linear(keys[0], num_features, h1)
    w2, b2 = linear(keys[1], h1, h2)
    wmu, bmu = linear(keys[2], h2, rep_dims)
    wd1, bd1 = linear(keys[3], rep_dims, h2)
    wd2, bd2 = linear(keys[4], h2, h1)
    wd3, bd3 = linear(keys[5], h1, 1)
    return dict(w1=w1, b1=b1, w2=w2, b2=b2, wmu=wmu, bmu=bmu,
                wd1=wd1, bd1=bd1, wd2=wd2, bd2=bd2, wd3=wd3, bd3=bd3)


def reference_forward(features, p):
    """Faithful f32 reference of the original PyTorch module."""
    x = features.astype(jnp.float32)
    h = jnp.maximum(x @ p["w1"].T + p["b1"].T, 0.0)
    h = jnp.maximum(h @ p["w2"].T + p["b2"].T, 0.0)
    mu = h @ p["wmu"].T + p["bmu"].T
    d = jnp.maximum(mu @ p["wd1"].T + p["bd1"].T, 0.0)
    d = jnp.maximum(d @ p["wd2"].T + p["bd2"].T, 0.0)
    out = d @ p["wd3"].T + p["bd3"].T            # (B, 1)
    return jnp.squeeze(out, axis=-1)


def reference_forward_matched(features, p):
    """Reference in the kernel's precision (bf16 MXU operands, f32 accumulate,
    mu_layer folded) -- should match the Pallas kernel to ~f32 rounding."""
    w1, b1, w2, b2, wdf, bdf, wd2, bd2, wd3, bd3 = _prepare_kernel_params(p)
    f32, bf16 = jnp.float32, jnp.bfloat16

    def dense(w, b, a):
        return jnp.dot(a.astype(bf16), w.T, preferred_element_type=f32) + b.T

    h = jnp.maximum(dense(w1, b1, features), 0.0)
    h = jnp.maximum(dense(w2, b2, h), 0.0)
    d = jnp.maximum(dense(wdf, bdf, h), 0.0)
    d = jnp.maximum(dense(wd2, bd2, d), 0.0)
    out = d @ wd3 + bd3[0]                        # (B, 1)
    return jnp.squeeze(out, axis=-1)


if __name__ == "__main__":
    # Small shapes consistent with the module's forward.
    batch = 8
    num_features = 16
    rep_dims = 32
    hidden_1 = 32
    hidden_2 = 32

    key = jax.random.PRNGKey(0)
    k_params, k_x, k_x2 = jax.random.split(key, 3)
    params = init_params(k_params, num_features, rep_dims, hidden_1, hidden_2)

    features = jax.random.normal(k_x, (batch, num_features), dtype=jnp.float32)
    out = jax.block_until_ready(struct2param_vae_forward(features, params))
    assert out.shape == (batch,), f"bad shape {out.shape}"

    ref_matched = reference_forward_matched(features, params)
    ref_f32 = reference_forward(features, params)
    assert jnp.allclose(out, ref_matched, atol=2e-3, rtol=2e-3), \
        "mismatch vs precision-matched reference"
    assert jnp.allclose(out, ref_f32, atol=5e-2, rtol=5e-2), \
        "mismatch vs f32 module reference"

    # Also exercise the padded, multi-step grid path (grid=3 with TB=256).
    big = jax.random.normal(k_x2, (600, num_features), dtype=jnp.float32)
    out_big = jax.block_until_ready(
        struct2param_vae_forward(big, params, block_batch=256))
    assert out_big.shape == (600,), f"bad shape {out_big.shape}"
    assert jnp.allclose(out_big, reference_forward_matched(big, params),
                        atol=2e-3, rtol=2e-3), "mismatch on multi-tile path"

    print("KERNEL_OK")
</pallas_src>

<mosaic_0001>
module attributes {stable_mosaic.version = 11 : i64} {
  func.func @_vae_kernel(%arg0: i32, %arg1: memref<128x16xf32, #tpu.memory_space<vmem>>, %arg2: memref<32x16xbf16, #tpu.memory_space<vmem>>, %arg3: memref<32x1xf32, #tpu.memory_space<vmem>>, %arg4: memref<32x32xbf16, #tpu.memory_space<vmem>>, %arg5: memref<32x1xf32, #tpu.memory_space<vmem>>, %arg6: memref<32x32xbf16, #tpu.memory_space<vmem>>, %arg7: memref<32x1xf32, #tpu.memory_space<vmem>>, %arg8: memref<32x32xbf16, #tpu.memory_space<vmem>>, %arg9: memref<32x1xf32, #tpu.memory_space<vmem>>, %arg10: memref<32x1xf32, #tpu.memory_space<vmem>>, %arg11: memref<1x1xf32, #tpu.memory_space<vmem>>, %arg12: memref<1x128xf32, #tpu.memory_space<vmem>>) attributes {dimension_semantics = [#tpu.dimension_semantics<parallel>], iteration_bounds = array<i64: 1>, scalar_prefetch = 0 : i64, scratch_operands = 0 : i64, tpu.core_type = #tpu.core_type<tc>, window_params = [{transform_indices = @transform_0, window_bounds = array<i64: 128, 16>}, {pipeline_mode = #tpu.pipeline_mode<synchronous>, transform_indices = @transform_1, window_bounds = array<i64: 32, 16>}, {pipeline_mode = #tpu.pipeline_mode<synchronous>, transform_indices = @transform_2, window_bounds = array<i64: 32, 1>}, {pipeline_mode = #tpu.pipeline_mode<synchronous>, transform_indices = @transform_3, window_bounds = array<i64: 32, 32>}, {pipeline_mode = #tpu.pipeline_mode<synchronous>, transform_indices = @transform_4, window_bounds = array<i64: 32, 1>}, {pipeline_mode = #tpu.pipeline_mode<synchronous>, transform_indices = @transform_5, window_bounds = array<i64: 32, 32>}, {pipeline_mode = #tpu.pipeline_mode<synchronous>, transform_indices = @transform_6, window_bounds = array<i64: 32, 1>}, {pipeline_mode = #tpu.pipeline_mode<synchronous>, transform_indices = @transform_7, window_bounds = array<i64: 32, 32>}, {pipeline_mode = #tpu.pipeline_mode<synchronous>, transform_indices = @transform_8, window_bounds = array<i64: 32, 1>}, {pipeline_mode = #tpu.pipeline_mode<synchronous>, transform_indices = @transform_9, window_bounds = array<i64: 32, 1>}, {pipeline_mode = #tpu.pipeline_mode<synchronous>, transform_indices = @transform_10, window_bounds = array<i64: 1, 1>}, {transform_indices = @transform_11, window_bounds = array<i64: 1, 128>}]} {
    %c0 = arith.constant 0 : index
    %c0_0 = arith.constant 0 : index
    %0 = vector.load %arg1[%c0, %c0_0] : memref<128x16xf32, #tpu.memory_space<vmem>>, vector<128x16xf32>
    %1 = arith.truncf %0 : vector<128x16xf32> to vector<128x16xbf16>
    %c0_1 = arith.constant 0 : index
    %c0_2 = arith.constant 0 : index
    %2 = vector.load %arg2[%c0_1, %c0_2] : memref<32x16xbf16, #tpu.memory_space<vmem>>, vector<32x16xbf16>
    %cst = arith.constant dense<0.000000e+00> : vector<32x128xf32>
    %3 = tpu.matmul %2, %1, %cst {dimension_numbers = #tpu.dot_dimension_numbers<[1], [1], [0], [0], [0, 0, 1, 0], [], []>} : vector<32x16xbf16>, vector<128x16xbf16>, vector<32x128xf32> -> vector<32x128xf32>
    %c0_3 = arith.constant 0 : index
    %c0_4 = arith.constant 0 : index
    %4 = vector.load %arg3[%c0_3, %c0_4] : memref<32x1xf32, #tpu.memory_space<vmem>>, vector<32x1xf32>
    %5 = vector.broadcast %4 : vector<32x1xf32> to vector<32x128xf32>
    %6 = arith.addf %3, %5 : vector<32x128xf32>
    %cst_5 = arith.constant 0.000000e+00 : f32
    %7 = vector.broadcast %cst_5 : f32 to vector<32x128xf32>
    %8 = arith.maximumf %6, %7 : vector<32x128xf32>
    %c0_6 = arith.constant 0 : index
    %c0_7 = arith.constant 0 : index
    %9 = vector.load %arg4[%c0_6, %c0_7] : memref<32x32xbf16, #tpu.memory_space<vmem>>, vector<32x32xbf16>
    %10 = arith.truncf %8 : vector<32x128xf32> to vector<32x128xbf16>
    %cst_8 = arith.constant dense<0.000000e+00> : vector<32x128xf32>
    %11 = tpu.matmul %9, %10, %cst_8 {dimension_numbers = #tpu.dot_dimension_numbers<[1], [0], [0], [1], [0, 0, 1, 1], [], []>} : vector<32x32xbf16>, vector<32x128xbf16>, vector<32x128xf32> -> vector<32x128xf32>
    %c0_9 = arith.constant 0 : index
    %c0_10 = arith.constant 0 : index
    %12 = vector.load %arg5[%c0_9, %c0_10] : memref<32x1xf32, #tpu.memory_space<vmem>>, vector<32x1xf32>
    %13 = vector.broadcast %12 : vector<32x1xf32> to vector<32x128xf32>
    %14 = arith.addf %11, %13 : vector<32x128xf32>
    %cst_11 = arith.constant 0.000000e+00 : f32
    %15 = vector.broadcast %cst_11 : f32 to vector<32x128xf32>
    %16 = arith.maximumf %14, %15 : vector<32x128xf32>
    %c0_12 = arith.constant 0 : index
    %c0_13 = arith.constant 0 : index
    %17 = vector.load %arg6[%c0_12, %c0_13] : memref<32x32xbf16, #tpu.memory_space<vmem>>, vector<32x32xbf16>
    %18 = arith.truncf %16 : vector<32x128xf32> to vector<32x128xbf16>
    %cst_14 = arith.constant dense<0.000000e+00> : vector<32x128xf32>
    %19 = tpu.matmul %17, %18, %cst_14 {dimension_numbers = #tpu.dot_dimension_numbers<[1], [0], [0], [1], [0, 0, 1, 1], [], []>} : vector<32x32xbf16>, vector<32x128xbf16>, vector<32x128xf32> -> vector<32x128xf32>
    %c0_15 = arith.constant 0 : index
    %c0_16 = arith.constant 0 : index
    %20 = vector.load %arg7[%c0_15, %c0_16] : memref<32x1xf32, #tpu.memory_space<vmem>>, vector<32x1xf32>
    %21 = vector.broadcast %20 : vector<32x1xf32> to vector<32x128xf32>
    %22 = arith.addf %19, %21 : vector<32x128xf32>
    %cst_17 = arith.constant 0.000000e+00 : f32
    %23 = vector.broadcast %cst_17 : f32 to vector<32x128xf32>
    %24 = arith.maximumf %22, %23 : vector<32x128xf32>
    %c0_18 = arith.constant 0 : index
    %c0_19 = arith.constant 0 : index
    %25 = vector.load %arg8[%c0_18, %c0_19] : memref<32x32xbf16, #tpu.memory_space<vmem>>, vector<32x32xbf16>
    %26 = arith.truncf %24 : vector<32x128xf32> to vector<32x128xbf16>
    %cst_20 = arith.constant dense<0.000000e+00> : vector<32x128xf32>
    %27 = tpu.matmul %25, %26, %cst_20 {dimension_numbers = #tpu.dot_dimension_numbers<[1], [0], [0], [1], [0, 0, 1, 1], [], []>} : vector<32x32xbf16>, vector<32x128xbf16>, vector<32x128xf32> -> vector<32x128xf32>
    %c0_21 = arith.constant 0 : index
    %c0_22 = arith.constant 0 : index
    %28 = vector.load %arg9[%c0_21, %c0_22] : memref<32x1xf32, #tpu.memory_space<vmem>>, vector<32x1xf32>
    %29 = vector.broadcast %28 : vector<32x1xf32> to vector<32x128xf32>
    %30 = arith.addf %27, %29 : vector<32x128xf32>
    %cst_23 = arith.constant 0.000000e+00 : f32
    %31 = vector.broadcast %cst_23 : f32 to vector<32x128xf32>
    %32 = arith.maximumf %30, %31 : vector<32x128xf32>
    %c0_24 = arith.constant 0 : index
    %c0_25 = arith.constant 0 : index
    %33 = vector.load %arg10[%c0_24, %c0_25] : memref<32x1xf32, #tpu.memory_space<vmem>>, vector<32x1xf32>
    %34 = vector.broadcast %33 : vector<32x1xf32> to vector<32x128xf32>
    %35 = arith.mulf %32, %34 : vector<32x128xf32>
    %cst_26 = arith.constant dense<0.000000e+00> : vector<128xf32>
    %36 = vector.multi_reduction <add>, %35, %cst_26 [0] : vector<32x128xf32> to vector<128xf32>
    %37 = vector.shape_cast %36 : vector<128xf32> to vector<1x128xf32>
    %c0_27 = arith.constant 0 : index
    %c0_28 = arith.constant 0 : index
    %38 = vector.load %arg11[%c0_27, %c0_28] : memref<1x1xf32, #tpu.memory_space<vmem>>, vector<1x1xf32>
    %39 = vector.broadcast %38 : vector<1x1xf32> to vector<1x128xf32>
    %40 = arith.addf %37, %39 : vector<1x128xf32>
    %c0_29 = arith.constant 0 : index
    %c0_30 = arith.constant 0 : index
    %41 = vector.load %arg12[%c0_29, %c0_30] : memref<1x128xf32, #tpu.memory_space<vmem>>, vector<1x128xf32>
    tpu.vector_store %arg12[%c0_29, %c0_30], %40 {strides = array<i32>} : memref<1x128xf32, #tpu.memory_space<vmem>>, vector<1x128xf32>,
    return
  }
  func.func @transform_0(%arg0: i32) -> (i32, i32) {
    %c0_i32 = arith.constant 0 : i32
    %c0_i32_0 = arith.constant 0 : i32
    return %arg0, %c0_i32 : i32, i32
  }
  func.func @transform_1(%arg0: i32) -> (i32, i32) {
    %c0_i32 = arith.constant 0 : i32
    %c0_i32_0 = arith.constant 0 : i32
    %c0_i32_1 = arith.constant 0 : i32
    return %c0_i32, %c0_i32_0 : i32, i32
  }
  func.func @transform_2(%arg0: i32) -> (i32, i32) {
    %c0_i32 = arith.constant 0 : i32
    %c0_i32_0 = arith.constant 0 : i32
    %c0_i32_1 = arith.constant 0 : i32
    return %c0_i32, %c0_i32_0 : i32, i32
  }
  func.func @transform_3(%arg0: i32) -> (i32, i32) {
    %c0_i32 = arith.constant 0 : i32
    %c0_i32_0 = arith.constant 0 : i32
    %c0_i32_1 = arith.constant 0 : i32
    return %c0_i32, %c0_i32_0 : i32, i32
  }
  func.func @transform_4(%arg0: i32) -> (i32, i32) {
    %c0_i32 = arith.constant 0 : i32
    %c0_i32_0 = arith.constant 0 : i32
    %c0_i32_1 = arith.constant 0 : i32
    return %c0_i32, %c0_i32_0 : i32, i32
  }
  func.func @transform_5(%arg0: i32) -> (i32, i32) {
    %c0_i32 = arith.constant 0 : i32
    %c0_i32_0 = arith.constant 0 : i32
    %c0_i32_1 = arith.constant 0 : i32
    return %c0_i32, %c0_i32_0 : i32, i32
  }
  func.func @transform_6(%arg0: i32) -> (i32, i32) {
    %c0_i32 = arith.constant 0 : i32
    %c0_i32_0 = arith.constant 0 : i32
    %c0_i32_1 = arith.constant 0 : i32
    return %c0_i32, %c0_i32_0 : i32, i32
  }
  func.func @transform_7(%arg0: i32) -> (i32, i32) {
    %c0_i32 = arith.constant 0 : i32
    %c0_i32_0 = arith.constant 0 : i32
    %c0_i32_1 = arith.constant 0 : i32
    return %c0_i32, %c0_i32_0 : i32, i32
  }
  func.func @transform_8(%arg0: i32) -> (i32, i32) {
    %c0_i32 = arith.constant 0 : i32
    %c0_i32_0 = arith.constant 0 : i32
    %c0_i32_1 = arith.constant 0 : i32
    return %c0_i32, %c0_i32_0 : i32, i32
  }
  func.func @transform_9(%arg0: i32) -> (i32, i32) {
    %c0_i32 = arith.constant 0 : i32
    %c0_i32_0 = arith.constant 0 : i32
    %c0_i32_1 = arith.constant 0 : i32
    return %c0_i32, %c0_i32_0 : i32, i32
  }
  func.func @transform_10(%arg0: i32) -> (i32, i32) {
    %c0_i32 = arith.constant 0 : i32
    %c0_i32_0 = arith.constant 0 : i32
    %c0_i32_1 = arith.constant 0 : i32
    return %c0_i32, %c0_i32_0 : i32, i32
  }
  func.func @transform_11(%arg0: i32) -> (i32, i32) {
    %c0_i32 = arith.constant 0 : i32
    %c0_i32_0 = arith.constant 0 : i32
    return %c0_i32, %arg0 : i32, i32
  }
}

</mosaic_0001>

<bundles_post_ra>
// kernel: tpu_custom_call.1
= control target key start
LH: loop header
LB: loop body
LE: loop exit
PB: predicated region body
PF: predicated region fallthrough
CT: control target
= control target key end

     0   :  { %s723_s0 = inlined_call_operand.vmem [shape: f32[128,16], index: 0, kind: input, shape index: {}]   ;;  %s724_s1 = inlined_call_operand.vmem [shape: bf16[32,16], index: 1, kind: input, shape index: {}]   ;;  %s725_s2 = inlined_call_operand.vmem [shape: f32[32,1], index: 2, kind: input, shape index: {}]   ;;  %s726_s3 = inlined_call_operand.vmem [shape: bf16[32,32], index: 3, kind: input, shape index: {}]   ;;  %s727_s4 = inlined_call_operand.vmem [shape: f32[32,1], index: 4, kind: input, shape index: {}]   ;;  %s728_s5 = inlined_call_operand.vmem [shape: bf16[32,32], index: 5, kind: input, shape index: {}]   ;;  %s729_s6 = inlined_call_operand.vmem [shape: f32[32,1], index: 6, kind: input, shape index: {}]   ;;  %s730_s7 = inlined_call_operand.vmem [shape: bf16[32,32], index: 7, kind: input, shape index: {}]   ;;  %s731_s8 = inlined_call_operand.vmem [shape: f32[32,1], index: 8, kind: input, shape index: {}]   ;;  %s732_s9 = inlined_call_operand.vmem [shape: f32[32,1], index: 9, kind: input, shape index: {}]   ;;  %s733_s10 = inlined_call_operand.<no memory space> [shape: f32[1,1], index: 10, kind: input, shape index: {}]   ;;  %s734_s11 = inlined_call_operand.hbm [shape: f32[1,128], index: 11, kind: output, shape index: {}]  }
   0x1   :  { %v16_v0 = vstv %s733_s10 }
   0x2   :  { %17 = vst [vmem:[#allocation2] sm:$0x1] %v16_v0 }
   0x3   :  { %v56_v1 = vld [vmem:[%s723_s0 + $0x70] sm:$0xff]  ;;  %v57_v2 = vld [vmem:[%s723_s0 + $0x78] sm:$0xff]  ;;  %vm104_vm0 = vcmask 130048   ;;  %v54_v4 = vld [vmem:[%s723_s0 + $0x60] sm:$0xff] }
   0x4   :  { %v65_v3 = vpack.c.bf16 %v57_v2, %v56_v1  ;;  %v55_v5 = vld [vmem:[%s723_s0 + $0x68] sm:$0xff] }
   0x6   :  { %v133_v6 = vsel %vm104_vm0, %v65_v3, 0 }
   0x7   :  { %18 = vsyncpa [#allocation4], 0  ;;  %135 = vmatpush.bf16.xpose.msra.mxu0 %v133_v6  ;;  %v64_v7 = vpack.c.bf16 %v55_v5, %v54_v4  ;;  %v52_v9 = vld [vmem:[%s723_s0 + $0x50] sm:$0xff]  ;;  %v53_v10 = vld [vmem:[%s723_s0 + $0x58] sm:$0xff]  ;;  %v507_v14 = vmov 0   ;;  %vm198_vm1 = vcmask 261120  }
   0x8   :  { %v72_v11 = vld [vmem:[%s725_s2 + $0x10] sm:$0xff]  ;;  %v70_v12 = vld [vmem:[%s725_s2] sm:$0xff]  ;;  %v63_v13 = vpack.c.bf16 %v53_v10, %v52_v9  ;;  %478 = vset.pattern.permute.xlu0 %v507_v14  ;;  %479 = vset.pattern.permute.xlu1 %v507_v14  ;;  %v51_v17 = vld [vmem:[%s723_s0 + $0x48] sm:$0xff]  ;;  %s419_s18 = sshll.u32 %s734_s11, 4  ;;  %s420_s18 = int_to_ptr.hbm [resolvable:$true] %s419_s18 }
   0x9   :  { %v130_v8 = vsel %vm104_vm0, %v64_v7, 0  ;;  %86 = vperm.xlu0 %478, %v72_v11   ;;  %76 = vperm.xlu1 %479, %v70_v12   ;;  %v50_v16 = vld [vmem:[%s723_s0 + $0x40] sm:$0xff]  ;;  %v73_v18 = vld [vmem:[%s725_s2 + $0x18] sm:$0xff]  ;;  %v71_v19 = vld [vmem:[%s725_s2 + $0x8] sm:$0xff] }
   0xa   :  { %480 = vset.pattern.permute.xlu2 %v507_v14  ;;  %v127_v15 = vsel %vm104_vm0, %v63_v13, 0  ;;  %v62_v20 = vpack.c.bf16 %v51_v17, %v50_v16  ;;  %v48_v22 = vld [vmem:[%s723_s0 + $0x30] sm:$0xff]  ;;  %v49_v23 = vld [vmem:[%s723_s0 + $0x38] sm:$0xff]  ;;  %v164_v24 = vld [vmem:[%s727_s4] sm:$0xff] }
   0xb   :  { %v165_v25 = vld [vmem:[%s727_s4 + $0x8] sm:$0xff]  ;;  %v61_v26 = vpack.c.bf16 %v49_v23, %v48_v22  ;;  %v46_v28 = vld [vmem:[%s723_s0 + $0x20] sm:$0xff]  ;;  %v237_v30 = vld [vmem:[%s729_s6 + $0x18] sm:$0xff] }
   0xc   :  { %v124_v21 = vsel %vm104_vm0, %v62_v20, 0  ;;  %v47_v29 = vld [vmem:[%s723_s0 + $0x28] sm:$0xff]  ;;  %v234_v31 = vld [vmem:[%s729_s6] sm:$0xff]  ;;  %v44_v34 = vld [vmem:[%s723_s0 + $0x10] sm:$0xff] }
   0xd   :  { %v121_v27 = vsel %vm104_vm0, %v61_v26, 0  ;;  %v60_v32 = vpack.c.bf16 %v47_v29, %v46_v28  ;;  %v45_v35 = vld [vmem:[%s723_s0 + $0x18] sm:$0xff]  ;;  %v303_v36 = vld [vmem:[%s731_s8] sm:$0xff]  ;;  %v304_v37 = vld [vmem:[%s731_s8 + $0x8] sm:$0xff] }
   0xe   :  { %v59_v38 = vpack.c.bf16 %v45_v35, %v44_v34  ;;  %v42_v40 = vld [vmem:[%s723_s0] sm:$0xff]  ;;  %v43_v41 = vld [vmem:[%s723_s0 + $0x8] sm:$0xff]  ;;  %v306_v42 = vld [vmem:[%s731_s8 + $0x18] sm:$0xff] }
   0xf   :  { %136 = vmatpush.bf16.xpose.msra.mxu0 %v130_v8  ;;  %v118_v33 = vsel %vm104_vm0, %v60_v32, 0  ;;  %v366_v43 = vld [vmem:[%s732_s9] sm:$0xff]  ;;  %v58_v44 = vpack.c.bf16 %v43_v41, %v42_v40  ;;  %v368_v46 = vld [vmem:[%s732_s9 + $0x10] sm:$0xff]  ;;  %v369_v47 = vld [vmem:[%s732_s9 + $0x18] sm:$0xff] }
  0x10   :  { %v115_v39 = vsel %vm104_vm0, %v59_v38, 0  ;;  %v468_v48 = vld [vmem:[%s724_s1] sm:$0xff]  ;;  %v469_v49 = vld [vmem:[%s724_s1 + $0x8] sm:$0xff]  ;;  %v166_v51 = vld [vmem:[%s727_s4 + $0x10] sm:$0xff] }
  0x11   :  { %91 = vperm.xlu0 %478, %v73_v18   ;;  %81 = vperm.xlu1 %479, %v71_v19   ;;  %v112_v45 = vsel %vm104_vm0, %v58_v44, 0  ;;  %v167_v53 = vld [vmem:[%s727_s4 + $0x18] sm:$0xff]  ;;  %v236_v57 = vld [vmem:[%s729_s6 + $0x10] sm:$0xff]  ;;  %v235_v3 = vld [vmem:[%s729_s6 + $0x8] sm:$0xff] }
  0x12   :  { %180 = vperm.xlu2 %480, %v166_v51   ;;  %v470_v8 = vld [vmem:[%s726_s3] sm:$0xff]  ;;  %v305_v9 = vld [vmem:[%s731_s8 + $0x10] sm:$0xff]  ;;  %v367_v10 = vld [vmem:[%s732_s9 + $0x8] sm:$0xff] }
  0x13   :  { %v471_v11 = vld [vmem:[%s726_s3 + $0x8] sm:$0xff]  ;;  %v403_v12 = vld [vmem:[#allocation2] sm:$0x1] }
  0x14   :  { %v473_v32 = vld [vmem:[%s728_s5 + $0x8] sm:$0xff]  ;;  %v474_v51 = vld [vmem:[%s730_s7] sm:$0xff] }
  0x17   :  { %137 = vmatpush.bf16.xpose.msra.mxu0 %v127_v15 }
  0x19   :  { %170 = vperm.xlu0 %478, %v164_v24   ;;  %175 = vperm.xlu1 %479, %v165_v25  }
  0x1a   :  { %185 = vperm.xlu2 %480, %v167_v53  }
  0x1f   :  { %138 = vmatpush.bf16.xpose.msra.mxu0 %v124_v21 }
  0x21   :  { %255 = vperm.xlu0 %478, %v237_v30   ;;  %240 = vperm.xlu1 %479, %v234_v31   ;;  %v472_v31 = vld [vmem:[%s728_s5] sm:$0xff] }
  0x22   :  { %250 = vperm.xlu2 %480, %v236_v57  }
  0x27   :  { %139 = vmatpush.bf16.xpose.msra.mxu0 %v121_v27 }
  0x29   :  { %309 = vperm.xlu0 %478, %v303_v36   ;;  %314 = vperm.xlu1 %479, %v304_v37  }
  0x2a   :  { %245 = vperm.xlu2 %480, %v235_v3  }
  0x2f   :  { %140 = vmatpush.bf16.xpose.msra.mxu0 %v118_v33 }
  0x31   :  { %324 = vperm.xlu0 %478, %v306_v42   ;;  %372 = vperm.xlu1 %479, %v366_v43  }
  0x32   :  { %319 = vperm.xlu2 %480, %v305_v9  }
  0x37   :  { %141 = vmatpush.bf16.xpose.msra.mxu0 %v115_v39 }
  0x39   :  { %382 = vperm.xlu0 %478, %v368_v46   ;;  %387 = vperm.xlu1 %479, %v369_v47  }
  0x3a   :  { %377 = vperm.xlu2 %480, %v367_v10  }
  0x3f   :  { %142 = vmatpush.bf16.xpose.msra.mxu0 %v112_v45 }
  0x42   :  { %406 = vperm.xlu2 %480, %v403_v12  }
  0x46   :  { %436 = vmatmul.msk.bf16.vlgmr.msra.gmra.mxu0 %vm104_vm0, %v468_v48 }
  0x56   :  { %437 = vmatmul.msk.bf16.gmra.mxu0 %vm104_vm0, %v469_v49 }
  0x6c   :  { %v181_v15 = vpop.permute.xlu2 %180 }
  0x74   :  { %v186_v19 = vpop.permute.xlu2 %185 }
  0x7b   :  { %v87_v54 = vpop.permute.xlu0 %86  ;;  %v77_v55 = vpop.permute.xlu1 %76 }
  0x7c   :  { %v251_v35 = vpop.permute.xlu2 %250 }
  0x83   :  { %v92_v58 = vpop.permute.xlu0 %91  ;;  %v82_v60 = vpop.permute.xlu1 %81 }
  0x84   :  { %v246_v39 = vpop.permute.xlu2 %245 }
  0x8b   :  { %v176_v17 = vpop.permute.xlu1 %175  ;;  %v171_v23 = vpop.permute.xlu0 %170 }
  0x8c   :  { %v320_v57 = vpop.permute.xlu2 %319 }
  0x93   :  { %v256_v37 = vpop.permute.xlu0 %255  ;;  %v241_v43 = vpop.permute.xlu1 %240 }
  0x94   :  { %v378_v3 = vpop.permute.xlu2 %377 }
  0xc3   :  { %v144_v50 = vpop.f32.mrf.mxu0 }
  0xc4   :  { %v145_v0 = vadd.f32 %v144_v50, %v77_v55  ;;  %v315_v55 = vpop.permute.xlu1 %314 }
  0xc6   :  { %v154_v6 = vmax.f32 %v145_v0, 0.0 }
  0xcb   :  { %v146_v52 = vpop.f32.mrf.mxu0 }
  0xcc   :  { %v147_v62 = vadd.f32 %v146_v52, %v82_v60  ;;  %v475_v52 = vld [vmem:[%s730_s7 + $0x8] sm:$0xff]  ;;  %s508_s7 = smov [#allocation3]  }
  0xcd   :  { %s417_s0 = sshll.u32 %s508_s7, 4  ;;  %s418_s0 = int_to_ptr.vmem [resolvable:$true] %s417_s0 }
  0xce   :  { %v155_v4 = vmax.f32 %v147_v62, 0.0 }
  0xd0   :  { %v162_v7 = vpack.c.bf16 %v155_v4, %v154_v6 }
  0xd3   :  { %v149_v56 = vpop.f32.mrf.mxu0 }
  0xd4   :  { %v150_v59 = vadd.f32 %v149_v56, %v87_v54  ;;  %v310_v54 = vpop.permute.xlu0 %309 }
  0xd6   :  { %v156_v1 = vmax.f32 %v150_v59, 0.0 }
  0xdb   :  { %v151_v61 = vpop.f32.mrf.mxu0 }
  0xdc   :  { %v152_v63 = vadd.f32 %v151_v61, %v92_v58  ;;  %v325_v58 = vpop.permute.xlu0 %324 }
  0xde   :  { %v157_v2 = vmax.f32 %v152_v63, 0.0  ;;  %v373_v63 = vpop.permute.xlu1 %372 }
  0xe0   :  { %v163_v5 = vpack.c.bf16 %v157_v2, %v156_v1 }
  0xe2   :  { %211 = vmatpush.bf16.msra.mxu1 %v163_v5 }
  0xe4   :  { %v383_v5 = vpop.permute.xlu0 %382 }
  0xe6   :  { %212 = vmatpush.bf16.msra.mxu1 %v162_v7  ;;  %v388_v12 = vpop.permute.xlu1 %387 }
  0xe9   :  { %446 = vmatmul.msk.bf16.vlgmr.msra.gmra.mxu1 %vm198_vm1, %v470_v8 }
  0xf9   :  { %447 = vmatmul.msk.bf16.gmra.mxu1 %vm198_vm1, %v471_v11 }
 0x166   :  { %v214_v13 = vpop.f32.mrf.mxu1 }
 0x167   :  { %v215_v24 = vadd.f32 %v214_v13, %v171_v23 }
 0x169   :  { %v224_v29 = vmax.f32 %v215_v24, 0.0 }
 0x16e   :  { %v216_v14 = vpop.f32.mrf.mxu1 }
 0x16f   :  { %v217_v21 = vadd.f32 %v216_v14, %v176_v17 }
 0x171   :  { %v225_v27 = vmax.f32 %v217_v21, 0.0 }
 0x173   :  { %v232_v30 = vpack.c.bf16 %v225_v27, %v224_v29 }
 0x176   :  { %v219_v16 = vpop.f32.mrf.mxu1 }
 0x177   :  { %v220_v18 = vadd.f32 %v219_v16, %v181_v15 }
 0x179   :  { %v226_v25 = vmax.f32 %v220_v18, 0.0 }
 0x17e   :  { %v221_v20 = vpop.f32.mrf.mxu1 }
 0x17f   :  { %v222_v22 = vadd.f32 %v221_v20, %v186_v19  ;;  %v407_v20 = vpop.permute.xlu2 %406 }
 0x181   :  { %v227_v26 = vmax.f32 %v222_v22, 0.0  ;;  %v409_v22 = vperm.slane %v407_v20, 0 }
 0x183   :  { %v233_v28 = vpack.c.bf16 %v227_v26, %v226_v25 }
 0x185   :  { %280 = vmatpush.bf16.msra.mxu2 %v233_v28 }
 0x189   :  { %281 = vmatpush.bf16.msra.mxu2 %v232_v30 }
 0x18c   :  { %456 = vmatmul.msk.bf16.vlgmr.msra.gmra.mxu2 %vm198_vm1, %v472_v31 }
 0x19c   :  { %457 = vmatmul.msk.bf16.gmra.mxu2 %vm198_vm1, %v473_v32 }
 0x20f   :  { %v283_v33 = vpop.f32.mrf.mxu2 }
 0x210   :  { %v284_v44 = vadd.f32 %v283_v33, %v241_v43 }
 0x212   :  { %v293_v49 = vmax.f32 %v284_v44, 0.0 }
 0x217   :  { %v285_v34 = vpop.f32.mrf.mxu2 }
 0x218   :  { %v286_v41 = vadd.f32 %v285_v34, %v246_v39 }
 0x21a   :  { %v294_v47 = vmax.f32 %v286_v41, 0.0 }
 0x21c   :  { %v301_v50 = vpack.c.bf16 %v294_v47, %v293_v49 }
 0x21f   :  { %v288_v36 = vpop.f32.mrf.mxu2 }
 0x220   :  { %v289_v38 = vadd.f32 %v288_v36, %v251_v35 }
 0x222   :  { %v295_v45 = vmax.f32 %v289_v38, 0.0 }
 0x227   :  { %v290_v40 = vpop.f32.mrf.mxu2 }
 0x228   :  { %v291_v42 = vadd.f32 %v290_v40, %v256_v37 }
 0x22a   :  { %v296_v46 = vmax.f32 %v291_v42, 0.0 }
 0x22c   :  { %v302_v48 = vpack.c.bf16 %v296_v46, %v295_v45 }
 0x22e   :  { %349 = vmatpush.bf16.msra.mxu3 %v302_v48 }
 0x232   :  { %350 = vmatpush.bf16.msra.mxu3 %v301_v50 }
 0x235   :  { %466 = vmatmul.msk.bf16.vlgmr.msra.gmra.mxu3 %vm198_vm1, %v474_v51 }
 0x245   :  { %467 = vmatmul.msk.bf16.gmra.mxu3 %vm198_vm1, %v475_v52 }
 0x2b8   :  { %v352_v53 = vpop.f32.mrf.mxu3 }
 0x2b9   :  { %v353_v61 = vadd.f32 %v352_v53, %v310_v54 }
 0x2bb   :  { %v362_v1 = vmax.f32 %v353_v61, 0.0 }
 0x2bd   :  { %v390_v7 = vmul.f32 %v373_v63, %v362_v1 }
 0x2c0   :  { %v354_v56 = vpop.f32.mrf.mxu3 }
 0x2c1   :  { %v355_v59 = vadd.f32 %v354_v56, %v315_v55 }
 0x2c3   :  { %v363_v0 = vmax.f32 %v355_v59, 0.0 }
 0x2c5   :  { %v391_v4 = vmul.f32 %v378_v3, %v363_v0 }
 0x2c7   :  { %v394_v10 = vadd.f32 %v391_v4, %v390_v7 }
 0x2c8   :  { %v357_v60 = vpop.f32.mrf.mxu3 }
 0x2c9   :  { %v358_v62 = vadd.f32 %v357_v60, %v320_v57 }
 0x2cb   :  { %v364_v2 = vmax.f32 %v358_v62, 0.0 }
 0x2cd   :  { %v392_v8 = vmul.f32 %v383_v5, %v364_v2 }
 0x2cf   :  { %v395_v13 = vadd.f32 %v394_v10, %v392_v8 }
 0x2d0   :  { %v359_v6 = vpop.f32.mrf.mxu3 }
 0x2d1   :  { %v360_v9 = vadd.f32 %v359_v6, %v325_v58 }
 0x2d3   :  { %v365_v11 = vmax.f32 %v360_v9, 0.0 }
 0x2d5   :  { %v393_v14 = vmul.f32 %v388_v12, %v365_v11 }
 0x2d7   :  { %v396_v15 = vadd.f32 %v395_v13, %v393_v14 }
 0x2d9   :  { %v397_v16 = vrot.slane %v396_v15, 4 }
 0x2db   :  { %v398_v17 = vadd.f32 %v397_v16, %v396_v15 }
 0x2dd   :  { %v399_v18 = vrot.slane %v398_v17, 2 }
 0x2df   :  { %v400_v19 = vadd.f32 %v399_v18, %v398_v17 }
 0x2e1   :  { %v401_v21 = vrot.slane %v400_v19, 1 }
 0x2e3   :  { %v402_v23 = vadd.f32 %v401_v21, %v400_v19 }
 0x2e5   :  { %v410_v24 = vadd.f32 %v409_v22, %v402_v23 }
 0x2e7   :  { %411 = vst [vmem:[#allocation3] sm:$0x1] %v410_v24 }
 0x2e8   :  { %422 = dma.vmem_to_hbm [thread:$0]  %s418_s0, 16, %s420_s18, [#allocation4]  }
 0x2e9   :  { %505 = dma.done.wait [#allocation4], 16  }
 0x2ea   :  { %506 = vsyncadd [#allocation4], 4294967280 }
 0x2eb   :  { %427 = vsyncpa [#allocation4], 1 }

</bundles_post_ra>
